<compile_context>
chip_gen: v7x
topology: tpu7x:2x2x1
jax: 0.10.0
libtpu: 0.0.40
codegen_flags: <defaults>
</compile_context>

<pallas_src>
import functools

import jax
import jax.numpy as jnp
from jax.experimental import pallas as pl
from jax.experimental.pallas import tpu as pltpu


def _ce_label_smooth_kernel(logits_ref, targets_ref, out_ref, *, epsilon,
                            num_classes, batch_size, block_rows):
    # logits_ref: (TB, K) native dtype; targets_ref: (TB, 1) int32;
    # out_ref: (1, 1, 1) f32 partial (un-normalized) loss sum for this tile.
    x = logits_ref[...].astype(jnp.float32)                      # (TB, K)
    t = targets_ref[...]                                         # (TB, 1)
    tb, k = x.shape

    # Row-validity mask for the (possibly ragged) last block.
    row_start = pl.program_id(0) * block_rows
    row_ids = jax.lax.broadcasted_iota(jnp.int32, (tb, 1), 0) + row_start
    valid = row_ids < batch_size                                 # (TB, 1)

    # Per-row statistics only; no (TB, K) log_probs / one_hot / smoothed arrays.
    m = jnp.max(x, axis=1, keepdims=True)                        # (TB, 1)
    s = jnp.sum(jnp.exp(x - m), axis=1, keepdims=True)           # (TB, 1)
    lse = m + jnp.log(s)                                         # (TB, 1) logsumexp
    rowsum = jnp.sum(x, axis=1, keepdims=True)                   # (TB, 1)

    # Gather x[b, t_b] via iota compare + select (VPU; torch scatter_ equivalent).
    class_ids = jax.lax.broadcasted_iota(jnp.int32, (tb, k), 1)  # (TB, K)
    x_t = jnp.sum(jnp.where(class_ids == t, x, 0.0), axis=1, keepdims=True)

    # Folded label-smoothing cross-entropy per row.
    per_row = (1.0 - epsilon) * (lse - x_t) \
        + (epsilon / num_classes) * (jnp.float32(num_classes) * lse - rowsum)
    per_row = jnp.where(valid, per_row, 0.0)                     # mask padded rows

    out_ref[...] = jnp.sum(per_row).reshape(1, 1, 1)


def _choose_block_rows(batch, num_classes, itemsize, sublane,
                       tile_bytes_budget=8 * 1024 * 1024):
    """Largest batch tile whose double-buffered logits fit the VMEM budget."""
    rows = (tile_bytes_budget // 2) // max(1, num_classes * itemsize)
    rows = min(int(rows), 512)            # per-step overhead well amortized by 512 rows
    rows = (rows // sublane) * sublane
    rows = max(rows, sublane)
    if rows >= batch:
        return batch                      # single block: full-dim exception applies
    return rows


def cross_entropy_label_smooth(logits, targets, *, num_classes, epsilon=0.1,
                               block_rows=None,
                               vmem_limit_bytes=32 * 1024 * 1024):
    """logits: (B, num_classes) float; targets: (B,) int class indices -> scalar f32."""
    B, K = logits.shape
    assert K == num_classes
    targets2d = targets.astype(jnp.int32).reshape(B, 1)

    itemsize = jnp.dtype(logits.dtype).itemsize
    sublane = max(8, 32 // itemsize)      # 8 rows f32, 16 bf16, 32 int8/fp8 packing
    if block_rows is None:
        block_rows = _choose_block_rows(B, K, itemsize, sublane)
    tb = int(block_rows)
    num_blocks = pl.cdiv(B, tb)

    kernel = functools.partial(
        _ce_label_smooth_kernel,
        epsilon=float(epsilon),
        num_classes=int(num_classes),
        batch_size=int(B),
        block_rows=tb,
    )

    # TODO(synk): for very large vocabularies (a single (tb, K) row-tile exceeding the
    # VMEM budget) add a second "arbitrary" grid axis over K with online-softmax
    # running (m, l, target-term, rowsum) stats carried in VMEM scratch.
    grid_spec = pltpu.PrefetchScalarGridSpec(
        num_scalar_prefetch=0,
        grid=(num_blocks,),
        in_specs=[
            pl.BlockSpec((tb, K), lambda i: (i, 0)),   # logits tile (lane-dense K)
            pl.BlockSpec((tb, 1), lambda i: (i, 0)),   # int32 targets tile in VMEM
        ],
        out_specs=pl.BlockSpec((1, 1, 1), lambda i: (i, 0, 0)),  # per-block partial
    )

    partials = pl.pallas_call(
        kernel,
        out_shape=jax.ShapeDtypeStruct((num_blocks, 1, 1), jnp.float32),
        grid_spec=grid_spec,
        compiler_params=pltpu.CompilerParams(
            dimension_semantics=("parallel",),
            vmem_limit_bytes=int(vmem_limit_bytes),
        ),
    )(logits, targets2d)

    return jnp.sum(partials) / jnp.float32(B)


def _reference(logits, targets, num_classes, epsilon=0.1):
    log_probs = jax.nn.log_softmax(logits.astype(jnp.float32), axis=1)
    one_hot = jax.nn.one_hot(targets, num_classes, dtype=jnp.float32)
    smoothed = (1.0 - epsilon) * one_hot + epsilon / num_classes
    return jnp.sum(jnp.mean(-smoothed * log_probs, axis=0))


if __name__ == "__main__":
    key = jax.random.PRNGKey(0)
    k1, k2, k3, k4 = jax.random.split(key, 4)

    # Case 1: small batch, single block (tb == B full-dim path).
    B, K = 8, 32
    logits = jax.random.normal(k1, (B, K), dtype=jnp.float32)
    targets = jax.random.randint(k2, (B,), 0, K, dtype=jnp.int32)
    loss = jax.block_until_ready(
        cross_entropy_label_smooth(logits, targets, num_classes=K, epsilon=0.1))
    ref = _reference(logits, targets, K, epsilon=0.1)
    assert jnp.allclose(loss, ref, atol=2e-5, rtol=2e-5), (loss, ref)

    # Case 2: multi-block grid with a ragged last block (B=20, block_rows=8).
    B2, K2 = 20, 40
    logits2 = jax.random.normal(k3, (B2, K2), dtype=jnp.float32)
    targets2 = jax.random.randint(k4, (B2,), 0, K2, dtype=jnp.int32)
    loss2 = jax.block_until_ready(
        cross_entropy_label_smooth(logits2, targets2, num_classes=K2,
                                   epsilon=0.1, block_rows=8))
    ref2 = _reference(logits2, targets2, K2, epsilon=0.1)
    assert jnp.allclose(loss2, ref2, atol=2e-5, rtol=2e-5), (loss2, ref2)

    print("KERNEL_OK")
</pallas_src>

<mosaic_0001>
module attributes {stable_mosaic.version = 11 : i64} {
  func.func @_ce_label_smooth_kernel(%arg0: i32, %arg1: memref<8x32xf32, #tpu.memory_space<vmem>>, %arg2: memref<8x1xi32, #tpu.memory_space<vmem>>, %arg3: memref<1x1x1xf32, #tpu.memory_space<vmem>>) attributes {dimension_semantics = [#tpu.dimension_semantics<parallel>], iteration_bounds = array<i64: 1>, scalar_prefetch = 0 : i64, scratch_operands = 0 : i64, tpu.core_type = #tpu.core_type<tc>, window_params = [{transform_indices = @transform_0, window_bounds = array<i64: 8, 32>}, {transform_indices = @transform_1, window_bounds = array<i64: 8, 1>}, {transform_indices = @transform_2, window_bounds = array<i64: 1, 1, 1>}]} {
    %c0 = arith.constant 0 : index
    %c0_0 = arith.constant 0 : index
    %0 = vector.load %arg1[%c0, %c0_0] : memref<8x32xf32, #tpu.memory_space<vmem>>, vector<8x32xf32>
    %c0_1 = arith.constant 0 : index
    %c0_2 = arith.constant 0 : index
    %1 = vector.load %arg2[%c0_1, %c0_2] : memref<8x1xi32, #tpu.memory_space<vmem>>, vector<8x1xi32>
    %c8_i32 = arith.constant 8 : i32
    %2 = arith.muli %arg0, %c8_i32 : i32
    %3 = tpu.iota {dimensions = array<i32: 0>} : vector<8x1xi32>
    %4 = vector.broadcast %2 : i32 to vector<8x1xi32>
    %5 = arith.addi %3, %4 : vector<8x1xi32>
    %c8_i32_3 = arith.constant 8 : i32
    %6 = vector.broadcast %c8_i32_3 : i32 to vector<8x1xi32>
    %7 = arith.cmpi slt, %5, %6 : vector<8x1xi32>
    %cst = arith.constant dense<0xFF800000> : vector<8xf32>
    %8 = vector.multi_reduction <maximumf>, %0, %cst [1] : vector<8x32xf32> to vector<8xf32>
    %9 = vector.shape_cast %8 : vector<8xf32> to vector<8x1xf32>
    %10 = vector.broadcast %9 : vector<8x1xf32> to vector<8x32xf32>
    %11 = arith.subf %0, %10 : vector<8x32xf32>
    %12 = math.exp %11 : vector<8x32xf32>
    %cst_4 = arith.constant dense<0.000000e+00> : vector<8xf32>
    %13 = vector.multi_reduction <add>, %12, %cst_4 [1] : vector<8x32xf32> to vector<8xf32>
    %14 = vector.shape_cast %13 : vector<8xf32> to vector<8x1xf32>
    %15 = math.log %14 : vector<8x1xf32>
    %16 = arith.addf %9, %15 : vector<8x1xf32>
    %cst_5 = arith.constant dense<0.000000e+00> : vector<8xf32>
    %17 = vector.multi_reduction <add>, %0, %cst_5 [1] : vector<8x32xf32> to vector<8xf32>
    %18 = vector.shape_cast %17 : vector<8xf32> to vector<8x1xf32>
    %19 = tpu.iota {dimensions = array<i32: 1>} : vector<8x32xi32>
    %20 = vector.broadcast %1 : vector<8x1xi32> to vector<8x32xi32>
    %21 = arith.cmpi eq, %19, %20 : vector<8x32xi32>
    %cst_6 = arith.constant 0.000000e+00 : f32
    %22 = vector.broadcast %cst_6 : f32 to vector<8x32xf32>
    %23 = arith.select %21, %0, %22 : vector<8x32xi1>, vector<8x32xf32>
    %cst_7 = arith.constant dense<0.000000e+00> : vector<8xf32>
    %24 = vector.multi_reduction <add>, %23, %cst_7 [1] : vector<8x32xf32> to vector<8xf32>
    %25 = vector.shape_cast %24 : vector<8xf32> to vector<8x1xf32>
    %26 = arith.subf %16, %25 : vector<8x1xf32>
    %cst_8 = arith.constant 0.899999976 : f32
    %27 = vector.broadcast %cst_8 : f32 to vector<8x1xf32>
    %28 = arith.mulf %27, %26 : vector<8x1xf32>
    %cst_9 = arith.constant 3.200000e+01 : f32
    %29 = vector.broadcast %cst_9 : f32 to vector<8x1xf32>
    %30 = arith.mulf %29, %16 : vector<8x1xf32>
    %31 = arith.subf %30, %18 : vector<8x1xf32>
    %cst_10 = arith.constant 3.125000e-03 : f32
    %32 = vector.broadcast %cst_10 : f32 to vector<8x1xf32>
    %33 = arith.mulf %32, %31 : vector<8x1xf32>
    %34 = arith.addf %28, %33 : vector<8x1xf32>
    %cst_11 = arith.constant 0.000000e+00 : f32
    %35 = vector.broadcast %cst_11 : f32 to vector<8x1xf32>
    %36 = arith.select %7, %34, %35 : vector<8x1xi1>, vector<8x1xf32>
    %37 = vector.shape_cast %36 : vector<8x1xf32> to vector<1x8x1xf32>
    %cst_12 = arith.constant dense<0.000000e+00> : vector<1xf32>
    %38 = vector.multi_reduction <add>, %37, %cst_12 [1, 2] : vector<1x8x1xf32> to vector<1xf32>
    %39 = vector.shape_cast %38 : vector<1xf32> to vector<1x1x1xf32>
    %40 = vector.extract %39[0, 0, 0] : f32 from vector<1x1x1xf32>
    %41 = vector.broadcast %40 : f32 to vector<1x1x1xf32>
    %c0_13 = arith.constant 0 : index
    %c0_14 = arith.constant 0 : index
    %c0_15 = arith.constant 0 : index
    %42 = vector.load %arg3[%c0_13, %c0_14, %c0_15] : memref<1x1x1xf32, #tpu.memory_space<vmem>>, vector<1x1x1xf32>
    tpu.vector_store %arg3[%c0_13, %c0_14, %c0_15], %41 {strides = array<i32>} : memref<1x1x1xf32, #tpu.memory_space<vmem>>, vector<1x1x1xf32>,
    return
  }
  func.func @transform_0(%arg0: i32) -> (i32, i32) {
    %c0_i32 = arith.constant 0 : i32
    %c0_i32_0 = arith.constant 0 : i32
    return %arg0, %c0_i32 : i32, i32
  }
  func.func @transform_1(%arg0: i32) -> (i32, i32) {
    %c0_i32 = arith.constant 0 : i32
    %c0_i32_0 = arith.constant 0 : i32
    return %arg0, %c0_i32 : i32, i32
  }
  func.func @transform_2(%arg0: i32) -> (i32, i32, i32) {
    %c0_i32 = arith.constant 0 : i32
    %c0_i32_0 = arith.constant 0 : i32
    %c0_i32_1 = arith.constant 0 : i32
    return %arg0, %c0_i32, %c0_i32_0 : i32, i32, i32
  }
}

</mosaic_0001>

<bundles_post_ra>
// kernel: tpu_custom_call.1
= control target key start
LH: loop header
LB: loop body
LE: loop exit
PB: predicated region body
PF: predicated region fallthrough
CT: control target
= control target key end

     0   :  { %vm20_vm0 = vcmask 261120   ;;  %s153_s0 = inlined_call_operand.vmem [shape: f32[8,32], index: 0, kind: input, shape index: {}]   ;;  %s154_s1 = inlined_call_operand.vmem [shape: s32[8,1], index: 1, kind: input, shape index: {}]   ;;  %s155_s2 = inlined_call_operand.hbm [shape: f32[1,1,1], index: 2, kind: output, shape index: {}]  }
   0x1   :  { %v12_v0 = vld [vmem:[%s153_s0] sm:$0xff] }
   0x2   :  { %7 = vsyncpa [#allocation3], 0  ;;  %v21_v1 = vsel %vm20_vm0, %v12_v0, -inf  ;;  %v114_v2 = vmov 0   ;;  %v13_v3 = vld [vmem:[%s154_s1] sm:$0xff]  ;;  %v36_v7 = vlaneseq  ;;  %v33_v12 = vsel %vm20_vm0, %v12_v0, 0.0 }
   0x3   :  { %85 = vset.pattern.permute.xlu0 %v114_v2  ;;  %vm53_vm2 = vcmask 7168   ;;  %s115_s0 = smov [#allocation2]   ;;  %vm65_vm3 = vcmask 0  }
   0x4   :  { %22 = vmax.xlane.f32.xlu0 %v21_v1  ;;  %v37_v8 = vand.u32 127, %v36_v7  ;;  %s73_s1 = sshll.u32 %s115_s0, 4  ;;  %s74_s1 = int_to_ptr.vmem [resolvable:$true] %s73_s1 }
   0x5   :  { %s90_s14 = scalar_lea.vmem %s74_s1, 16  ;;  %s94_s15 = scalar_lea.vmem %s74_s1, 32 }
   0x6   :  { %p91_p0 = scmp.ne.s32.totalorder %s74_s1, %s90_s14  ;;  %p95_p1 = scmp.lt.s32.totalorder %s74_s1, %s74_s1 }
   0x7   :  { %p96_p2 = scmp.lt.s32.totalorder %s94_s15, %s90_s14 }
   0x9   :  { %p97_p3 = por %p96_p2, %p95_p1 }
   0xb   :  { %p98_p4 = pnand %p97_p3, %p91_p0 }
  0x1a   :  { %39 = vperm.xlu0 %85, %v13_v3  }
  0x91   :  { %v23_v4 = vpop.xlane.xlu0 %22 }
  0x92   :  { %v24_v5 = vsub.f32 %v12_v0, %v23_v4 }
  0x94   :  { %v25_v6 = vmul.f32 1.442695, %v24_v5 }
  0x96   :  { %86 = vpow2.f32 %v25_v6 }
  0x99   :  { %v40_v9 = vpop.permute.xlu0 %39 }
  0x9a   :  { %vm41_vm1 = vcmp.eq.s32.totalorder %v37_v8, %v40_v9 }
  0x9b   :  { %v42_v13 = vsel %vm41_vm1, %v12_v0, 0.0 }
  0x9c   :  { %v43_v14 = vsel %vm20_vm0, %v42_v13, 0.0 }
  0xa0   :  { %v87_v10 = vpop.eup %86 }
  0xa1   :  { %v27_v11 = vsel %vm20_vm0, %v87_v10, 0.0 }
  0xa2   :  { %28 = vadd.xlane.f32.xlu1 %v27_v11 }
  0xa6   :  { %34 = vadd.xlane.f32.xlu1 %v33_v12 }
  0xaa   :  { %44 = vadd.xlane.f32.xlu1 %v43_v14 }
 0x12f   :  { %v29_v15 = vpop.xlane.xlu1 %28 }
 0x130   :  { %88 = vlog2.f32 %v29_v15 }
 0x133   :  { %v35_v16 = vpop.xlane.xlu1 %34 }
 0x137   :  { %v45_v19 = vpop.xlane.xlu1 %44 }
 0x13a   :  { %v89_v17 = vpop.eup %88 }
 0x13b   :  { %v31_v18 = vmul.f32 0.6931472, %v89_v17 }
 0x13d   :  { %v32_v20 = vadd.f32 %v31_v18, %v23_v4 }
 0x13f   :  { %v48_v21 = vmul.f32 32.0, %v32_v20  ;;  %v46_v22 = vsub.f32 %v32_v20, %v45_v19 }
 0x141   :  { %v49_v23 = vsub.f32 %v48_v21, %v35_v16  ;;  %v47_v25 = vmul.f32 0.9, %v46_v22 }
 0x143   :  { %v50_v24 = vmul.f32 0.003125, %v49_v23 }
 0x145   :  { %v51_v26 = vadd.f32 %v50_v24, %v47_v25 }
 0x147   :  { %v54_v27 = vsel %vm53_vm2, %v51_v26, 0.0 }
 0x148   :  { %55 = vadd.xlane.f32.xlu1 %v54_v27 }
 0x1d5   :  { %v56_v28 = vpop.xlane.xlu1 %55 }
 0x1d6   :  { %v57_v29 = vrot.slane %v56_v28, 4 }
 0x1d8   :  { %v58_v30 = vadd.f32 %v57_v29, %v56_v28 }
 0x1da   :  { %v59_v31 = vrot.slane %v58_v30, 2 }
 0x1dc   :  { %v60_v32 = vadd.f32 %v59_v31, %v58_v30 }
 0x1de   :  { %v61_v33 = vrot.slane %v60_v32, 1 }
 0x1e0   :  { %v62_v34 = vadd.f32 %v61_v33, %v60_v32 }
 0x1e2   :  { %81 = vpush %v62_v34 }
 0x213   :  { %s82_s13 = spop %81 }
 0x214   :  { %v64_v35 = vstv %s82_s13 }
 0x215   :  { %66 = vst.msk [vmem:[#allocation2] sm:$0x1] %vm65_vm3, %v64_v35 }
 0x216   :  { %101 = shalt.err (!%p98_p4)
}
 0x217   :  { %s102_s18 = scalar_lea.hbm %s155_s2, 16 }
 0x218   :  { %p103_p5 = scmp.ne.s32.totalorder %s155_s2, %s102_s18  ;;  %p106_p6 = scmp.lt.u32.totalorder %s102_s18, %s155_s2 }
 0x21a   :  { %p108_p7 = pnand %p106_p6, %p103_p5 }
 0x21c   :  { %111 = shalt.err (!%p108_p7)
}
 0x21d   :  { %76 = dma.vmem_to_hbm [thread:$0]  %s74_s1, 16, %s155_s2, [#allocation3]  }
 0x21e   :  { %112 = dma.done.wait [#allocation3], 16  }
 0x21f   :  { %113 = vsyncadd [#allocation3], 4294967280 }
 0x220   :  { %80 = vsyncpa [#allocation3], 1 }

</bundles_post_ra>
